<compile_context>
chip_gen: v6e
topology: v6e:2x2x1
jax: 0.10.0
libtpu: 0.0.40
codegen_flags: <defaults>
</compile_context>

<pallas_src>
import functools

import jax
import jax.numpy as jnp
import numpy as np
from jax import lax
from jax.experimental import pallas as pl
from jax.experimental.pallas import tpu as pltpu

BN_EPS = 1e-5  # nn.BatchNorm2d default


def _round_up(v, m):
    return (v + m - 1) // m * m


def _conv_bn_relu_kernel(pT_ref, w_ref, params_ref, o_ref,
                         sum_ref, sumsq_ref, scale_ref, shift_ref,
                         *, inv_m, bn_eps):
    """Grid = (cout_tile, phase, m_tile).

    phase 0: conv tile -> accumulate per-channel sum / sumsq (f32 scratch);
             at the last m tile fold BN into scale/shift.
    phase 1: recompute conv tile, apply relu(conv * scale + shift), store.
    Zero-padded M columns / Cout rows contribute exactly 0 to the statistics.
    """
    phase = pl.program_id(1)
    m_idx = pl.program_id(2)

    # Conv tile on the MXU: (TCO, K) @ (K, TM) -> (TCO, TM), bf16 in, f32 accumulate.
    conv = jnp.dot(w_ref[...], pT_ref[...], preferred_element_type=jnp.float32)

    @pl.when(phase == 0)
    def _stats_pass():
        @pl.when(m_idx == 0)
        def _init():
            sum_ref[...] = jnp.zeros_like(sum_ref)
            sumsq_ref[...] = jnp.zeros_like(sumsq_ref)

        sum_ref[...] += jnp.sum(conv, axis=1, keepdims=True)
        sumsq_ref[...] += jnp.sum(conv * conv, axis=1, keepdims=True)

        @pl.when(m_idx == pl.num_programs(2) - 1)
        def _finalize():
            p = params_ref[...]                       # (TCO, 2): [gamma | beta]
            gamma = p[:, 0:1]
            beta = p[:, 1:2]
            mean = sum_ref[...] * inv_m
            # f32 sum/sumsq accumulation; clamp guards tiny negative from cancellation.
            var = jnp.maximum(sumsq_ref[...] * inv_m - mean * mean, 0.0)
            scale = gamma * lax.rsqrt(var + bn_eps)
            scale_ref[...] = scale
            shift_ref[...] = beta - mean * scale

    @pl.when(phase == 1)
    def _apply_pass():
        o_ref[...] = jnp.maximum(conv * scale_ref[...] + shift_ref[...],
                                 0.0).astype(o_ref.dtype)


def _im2col_T(x, kernel_size, stride, padding):
    """Patches, already transposed and in bf16: (K, M) = (Cin*Kh*Kw, N*Hout*Wout).

    K ordering is (c, kh, kw), matching PyTorch's weight.reshape(Cout, Cin*Kh*Kw).
    M ordering is (n, ho, wo)."""
    N, C, H, W = x.shape
    kh = kw = kernel_size
    Hout = (H + 2 * padding - kh) // stride + 1
    Wout = (W + 2 * padding - kw) // stride + 1
    xp = jnp.pad(x.astype(jnp.bfloat16),
                 ((0, 0), (0, 0), (padding, padding), (padding, padding)))
    taps = []
    for i in range(kh):
        for j in range(kw):
            taps.append(lax.slice(
                xp,
                (0, 0, i, j),
                (N, C, i + (Hout - 1) * stride + 1, j + (Wout - 1) * stride + 1),
                (1, 1, stride, stride)))              # (N, C, Hout, Wout)
    t = jnp.stack(taps, axis=0)                       # (Kh*Kw, N, C, Ho, Wo)
    t = jnp.transpose(t, (2, 0, 1, 3, 4))             # (C, Kh*Kw, N, Ho, Wo)
    pT = t.reshape(C * kh * kw, N * Hout * Wout)      # (K, M)
    return pT, Hout, Wout


@functools.partial(jax.jit, static_argnames=("kernel_size", "stride", "padding"))
def conv_bn_relu(x, weight, bias, gamma, beta, *, kernel_size, stride, padding):
    """x: (N, Cin, H, W), weight: (Cout, Cin, Kh, Kw) -> (N, Cout, Hout, Wout)."""
    del bias  # per-channel conv bias cancels exactly under train-mode BN mean subtraction
    N, Cin, H, W = x.shape
    Cout = weight.shape[0]
    K = Cin * kernel_size * kernel_size

    pT, Hout, Wout = _im2col_T(x, kernel_size, stride, padding)   # (K, M) bf16
    M = N * Hout * Wout

    # ---- padding / tile selection -------------------------------------------------
    K_pad = _round_up(K, 8)                       # sublane-aligned contraction dim
    TM = min(512, _round_up(M, 128))              # lane-dense M tile (128..512)
    M_pad = _round_up(M, TM)
    Cout_p = _round_up(Cout, 8)
    TCO = min(Cout_p, 256)                        # up to 256-wide channel tile (v6e MXU)
    Cout_p = _round_up(Cout_p, TCO)
    n_co = Cout_p // TCO
    n_m = M_pad // TM

    pT = jnp.pad(pT, ((0, K_pad - K), (0, M_pad - M)))
    w_mat = jnp.pad(weight.reshape(Cout, K).astype(jnp.bfloat16),
                    ((0, Cout_p - Cout), (0, K_pad - K)))
    params = jnp.pad(jnp.stack([gamma, beta], axis=1).astype(jnp.float32),
                     ((0, Cout_p - Cout), (0, 0)))               # (Cout_p, 2)

    kernel = functools.partial(_conv_bn_relu_kernel,
                               inv_m=1.0 / M, bn_eps=BN_EPS)

    out_t = pl.pallas_call(
        kernel,
        out_shape=jax.ShapeDtypeStruct((Cout_p, M_pad), jnp.float32),
        grid_spec=pltpu.PrefetchScalarGridSpec(
            num_scalar_prefetch=0,
            grid=(n_co, 2, n_m),   # (channel tiles, phase: 0=stats / 1=apply, M tiles)
            in_specs=[
                pl.BlockSpec((K_pad, TM), lambda co, ph, m: (0, m)),
                pl.BlockSpec((TCO, K_pad), lambda co, ph, m: (co, 0)),
                pl.BlockSpec((TCO, 2), lambda co, ph, m: (co, 0)),
            ],
            # During the stats phase (ph == 0) the output index is pinned to (co, 0) so
            # the output buffer stays resident and no unwritten tiles hit HBM; phase 1
            # visits every (co, m) block and its stores are what lands in HBM.
            out_specs=pl.BlockSpec((TCO, TM), lambda co, ph, m: (co, m * ph)),
            scratch_shapes=[pltpu.VMEM((TCO, 1), jnp.float32)] * 4,
        ),
        compiler_params=pltpu.CompilerParams(
            dimension_semantics=("parallel", "arbitrary", "arbitrary"),
        ),
    )(pT, w_mat, params)

    out = out_t[:Cout, :M].reshape(Cout, N, Hout, Wout)
    return jnp.transpose(out, (1, 0, 2, 3))           # back to NCHW


def _reference(x, weight, bias, gamma, beta, stride, padding):
    # Matches the kernel's precision: bf16-rounded conv operands, f32 accumulation,
    # f32 BN with batch statistics (biased variance), ReLU.
    xq = x.astype(jnp.bfloat16).astype(jnp.float32)
    wq = weight.astype(jnp.bfloat16).astype(jnp.float32)
    conv = lax.conv_general_dilated(
        xq, wq, window_strides=(stride, stride),
        padding=((padding, padding), (padding, padding)),
        dimension_numbers=("NCHW", "OIHW", "NCHW"),
        precision=lax.Precision.HIGHEST,
    ) + bias.reshape(1, -1, 1, 1)
    mu = jnp.mean(conv, axis=(0, 2, 3), keepdims=True)
    var = jnp.mean((conv - mu) ** 2, axis=(0, 2, 3), keepdims=True)
    norm = (conv - mu) * lax.rsqrt(var + BN_EPS)
    out = norm * gamma.reshape(1, -1, 1, 1) + beta.reshape(1, -1, 1, 1)
    return jnp.maximum(out, 0.0)


if __name__ == "__main__":
    # ConvBNReLU(in_n=4, out_n=8, kernel_size=3, stride=1, padding=1)
    in_n, out_n, ksize, stride, padding = 4, 8, 3, 1, 1
    N, H, W = 2, 16, 16

    key = jax.random.PRNGKey(0)
    kx, kw_, kb, kg, kbt = jax.random.split(key, 5)

    x = jax.random.normal(kx, (N, in_n, H, W), dtype=jnp.float32)
    weight = 0.1 * jax.random.normal(kw_, (out_n, in_n, ksize, ksize), dtype=jnp.float32)
    bias = 0.1 * jax.random.normal(kb, (out_n,), dtype=jnp.float32)
    gamma = 1.0 + 0.1 * jax.random.normal(kg, (out_n,), dtype=jnp.float32)
    beta = 0.1 * jax.random.normal(kbt, (out_n,), dtype=jnp.float32)

    out = conv_bn_relu(
        x, weight, bias, gamma, beta,
        kernel_size=ksize, stride=stride, padding=padding,
    )
    out = jax.block_until_ready(out)

    ref = _reference(x, weight, bias, gamma, beta, stride, padding)
    np.testing.assert_allclose(np.asarray(out), np.asarray(ref), atol=1e-3, rtol=1e-3)

    print("KERNEL_OK")
</pallas_src>

<mosaic_0001>
module attributes {stable_mosaic.version = 11 : i64} {
  func.func @_conv_bn_relu_kernel(%arg0: i32, %arg1: i32, %arg2: i32, %arg3: memref<40x512xbf16, #tpu.memory_space<vmem>>, %arg4: memref<8x40xbf16, #tpu.memory_space<vmem>>, %arg5: memref<8x2xf32, #tpu.memory_space<vmem>>, %arg6: memref<8x512xf32, #tpu.memory_space<vmem>>, %arg7: memref<8x1xf32, #tpu.memory_space<vmem>>, %arg8: memref<8x1xf32, #tpu.memory_space<vmem>>, %arg9: memref<8x1xf32, #tpu.memory_space<vmem>>, %arg10: memref<8x1xf32, #tpu.memory_space<vmem>>) attributes {dimension_semantics = [#tpu.dimension_semantics<parallel>, #tpu.dimension_semantics<arbitrary>, #tpu.dimension_semantics<arbitrary>], iteration_bounds = array<i64: 1, 2, 1>, scalar_prefetch = 0 : i64, scratch_operands = 4 : i64, tpu.core_type = #tpu.core_type<tc>, window_params = [{transform_indices = @transform_0, window_bounds = array<i64: 40, 512>}, {transform_indices = @transform_1, window_bounds = array<i64: 8, 40>}, {transform_indices = @transform_2, window_bounds = array<i64: 8, 2>}, {transform_indices = @transform_3, window_bounds = array<i64: 8, 512>}]} {
    %c0 = arith.constant 0 : index
    %c0_0 = arith.constant 0 : index
    %0 = vector.load %arg4[%c0, %c0_0] : memref<8x40xbf16, #tpu.memory_space<vmem>>, vector<8x40xbf16>
    %c0_1 = arith.constant 0 : index
    %c0_2 = arith.constant 0 : index
    %1 = vector.load %arg3[%c0_1, %c0_2] : memref<40x512xbf16, #tpu.memory_space<vmem>>, vector<40x512xbf16>
    %cst = arith.constant dense<0.000000e+00> : vector<8x512xf32>
    %2 = tpu.matmul %0, %1, %cst {dimension_numbers = #tpu.dot_dimension_numbers<[1], [0], [0], [1], [0, 0, 1, 1], [], []>} : vector<8x40xbf16>, vector<40x512xbf16>, vector<8x512xf32> -> vector<8x512xf32>
    %c0_i32 = arith.constant 0 : i32
    %3 = arith.cmpi eq, %arg1, %c0_i32 : i32
    %4 = arith.extui %3 : i1 to i32
    %c0_i32_3 = arith.constant 0 : i32
    %5 = arith.cmpi ne, %4, %c0_i32_3 : i32
    scf.if %5 {
      %c0_i32_5 = arith.constant 0 : i32
      %9 = arith.cmpi eq, %arg2, %c0_i32_5 : i32
      %10 = arith.extui %9 : i1 to i32
      %c0_i32_6 = arith.constant 0 : i32
      %11 = arith.cmpi ne, %10, %c0_i32_6 : i32
      scf.if %11 {
        %cst_19 = arith.constant 0.000000e+00 : f32
        %26 = vector.broadcast %cst_19 : f32 to vector<8x1xf32>
        %c0_20 = arith.constant 0 : index
        %c0_21 = arith.constant 0 : index
        %27 = vector.load %arg7[%c0_20, %c0_21] : memref<8x1xf32, #tpu.memory_space<vmem>>, vector<8x1xf32>
        tpu.vector_store %arg7[%c0_20, %c0_21], %26 {strides = array<i32>} : memref<8x1xf32, #tpu.memory_space<vmem>>, vector<8x1xf32>,
        %cst_22 = arith.constant 0.000000e+00 : f32
        %28 = vector.broadcast %cst_22 : f32 to vector<8x1xf32>
        %c0_23 = arith.constant 0 : index
        %c0_24 = arith.constant 0 : index
        %29 = vector.load %arg8[%c0_23, %c0_24] : memref<8x1xf32, #tpu.memory_space<vmem>>, vector<8x1xf32>
        tpu.vector_store %arg8[%c0_23, %c0_24], %28 {strides = array<i32>} : memref<8x1xf32, #tpu.memory_space<vmem>>, vector<8x1xf32>,
      } else {
      }
      %c0_7 = arith.constant 0 : index
      %c0_8 = arith.constant 0 : index
      %12 = vector.load %arg7[%c0_7, %c0_8] : memref<8x1xf32, #tpu.memory_space<vmem>>, vector<8x1xf32>
      %cst_9 = arith.constant dense<0.000000e+00> : vector<8xf32>
      %13 = vector.multi_reduction <add>, %2, %cst_9 [1] : vector<8x512xf32> to vector<8xf32>
      %14 = vector.shape_cast %13 : vector<8xf32> to vector<8x1xf32>
      %15 = arith.addf %12, %14 : vector<8x1xf32>
      %c0_10 = arith.constant 0 : index
      %c0_11 = arith.constant 0 : index
      %16 = vector.load %arg7[%c0_10, %c0_11] : memref<8x1xf32, #tpu.memory_space<vmem>>, vector<8x1xf32>
      tpu.vector_store %arg7[%c0_10, %c0_11], %15 {strides = array<i32>} : memref<8x1xf32, #tpu.memory_space<vmem>>, vector<8x1xf32>,
      %c0_12 = arith.constant 0 : index
      %c0_13 = arith.constant 0 : index
      %17 = vector.load %arg8[%c0_12, %c0_13] : memref<8x1xf32, #tpu.memory_space<vmem>>, vector<8x1xf32>
      %18 = arith.mulf %2, %2 : vector<8x512xf32>
      %cst_14 = arith.constant dense<0.000000e+00> : vector<8xf32>
      %19 = vector.multi_reduction <add>, %18, %cst_14 [1] : vector<8x512xf32> to vector<8xf32>
      %20 = vector.shape_cast %19 : vector<8xf32> to vector<8x1xf32>
      %21 = arith.addf %17, %20 : vector<8x1xf32>
      %c0_15 = arith.constant 0 : index
      %c0_16 = arith.constant 0 : index
      %22 = vector.load %arg8[%c0_15, %c0_16] : memref<8x1xf32, #tpu.memory_space<vmem>>, vector<8x1xf32>
      tpu.vector_store %arg8[%c0_15, %c0_16], %21 {strides = array<i32>} : memref<8x1xf32, #tpu.memory_space<vmem>>, vector<8x1xf32>,
      %c0_i32_17 = arith.constant 0 : i32
      %23 = arith.cmpi eq, %arg2, %c0_i32_17 : i32
      %24 = arith.extui %23 : i1 to i32
      %c0_i32_18 = arith.constant 0 : i32
      %25 = arith.cmpi ne, %24, %c0_i32_18 : i32
      scf.if %25 {
        %c0_19 = arith.constant 0 : index
        %c0_20 = arith.constant 0 : index
        %26 = vector.load %arg5[%c0_19, %c0_20] : memref<8x2xf32, #tpu.memory_space<vmem>>, vector<8x2xf32>
        %27 = vector.extract_strided_slice %26 {offsets = [0, 0], sizes = [8, 1], strides = [1, 1]} : vector<8x2xf32> to vector<8x1xf32>
        %28 = vector.extract_strided_slice %26 {offsets = [0, 1], sizes = [8, 1], strides = [1, 1]} : vector<8x2xf32> to vector<8x1xf32>
        %c0_21 = arith.constant 0 : index
        %c0_22 = arith.constant 0 : index
        %29 = vector.load %arg7[%c0_21, %c0_22] : memref<8x1xf32, #tpu.memory_space<vmem>>, vector<8x1xf32>
        %cst_23 = arith.constant 0.001953125 : f32
        %30 = vector.broadcast %cst_23 : f32 to vector<8x1xf32>
        %31 = arith.mulf %29, %30 : vector<8x1xf32>
        %c0_24 = arith.constant 0 : index
        %c0_25 = arith.constant 0 : index
        %32 = vector.load %arg8[%c0_24, %c0_25] : memref<8x1xf32, #tpu.memory_space<vmem>>, vector<8x1xf32>
        %cst_26 = arith.constant 0.001953125 : f32
        %33 = vector.broadcast %cst_26 : f32 to vector<8x1xf32>
        %34 = arith.mulf %32, %33 : vector<8x1xf32>
        %35 = arith.mulf %31, %31 : vector<8x1xf32>
        %36 = arith.subf %34, %35 : vector<8x1xf32>
        %cst_27 = arith.constant 0.000000e+00 : f32
        %37 = vector.broadcast %cst_27 : f32 to vector<8x1xf32>
        %38 = arith.maximumf %36, %37 : vector<8x1xf32>
        %cst_28 = arith.constant 9.99999974E-6 : f32
        %39 = vector.broadcast %cst_28 : f32 to vector<8x1xf32>
        %40 = arith.addf %38, %39 : vector<8x1xf32>
        %41 = math.rsqrt %40 : vector<8x1xf32>
        %42 = arith.mulf %27, %41 : vector<8x1xf32>
        %c0_29 = arith.constant 0 : index
        %c0_30 = arith.constant 0 : index
        %43 = vector.load %arg9[%c0_29, %c0_30] : memref<8x1xf32, #tpu.memory_space<vmem>>, vector<8x1xf32>
        tpu.vector_store %arg9[%c0_29, %c0_30], %42 {strides = array<i32>} : memref<8x1xf32, #tpu.memory_space<vmem>>, vector<8x1xf32>,
        %44 = arith.mulf %31, %42 : vector<8x1xf32>
        %45 = arith.subf %28, %44 : vector<8x1xf32>
        %c0_31 = arith.constant 0 : index
        %c0_32 = arith.constant 0 : index
        %46 = vector.load %arg10[%c0_31, %c0_32] : memref<8x1xf32, #tpu.memory_space<vmem>>, vector<8x1xf32>
        tpu.vector_store %arg10[%c0_31, %c0_32], %45 {strides = array<i32>} : memref<8x1xf32, #tpu.memory_space<vmem>>, vector<8x1xf32>,
      } else {
      }
    } else {
    }
    %c1_i32 = arith.constant 1 : i32
    %6 = arith.cmpi eq, %arg1, %c1_i32 : i32
    %7 = arith.extui %6 : i1 to i32
    %c0_i32_4 = arith.constant 0 : i32
    %8 = arith.cmpi ne, %7, %c0_i32_4 : i32
    scf.if %8 {
      %c0_5 = arith.constant 0 : index
      %c0_6 = arith.constant 0 : index
      %9 = vector.load %arg9[%c0_5, %c0_6] : memref<8x1xf32, #tpu.memory_space<vmem>>, vector<8x1xf32>
      %10 = vector.broadcast %9 : vector<8x1xf32> to vector<8x512xf32>
      %11 = arith.mulf %2, %10 : vector<8x512xf32>
      %c0_7 = arith.constant 0 : index
      %c0_8 = arith.constant 0 : index
      %12 = vector.load %arg10[%c0_7, %c0_8] : memref<8x1xf32, #tpu.memory_space<vmem>>, vector<8x1xf32>
      %13 = vector.broadcast %12 : vector<8x1xf32> to vector<8x512xf32>
      %14 = arith.addf %11, %13 : vector<8x512xf32>
      %cst_9 = arith.constant 0.000000e+00 : f32
      %15 = vector.broadcast %cst_9 : f32 to vector<8x512xf32>
      %16 = arith.maximumf %14, %15 : vector<8x512xf32>
      %c0_10 = arith.constant 0 : index
      %c0_11 = arith.constant 0 : index
      %17 = vector.load %arg6[%c0_10, %c0_11] : memref<8x512xf32, #tpu.memory_space<vmem>>, vector<8x512xf32>
      tpu.vector_store %arg6[%c0_10, %c0_11], %16 {strides = array<i32>} : memref<8x512xf32, #tpu.memory_space<vmem>>, vector<8x512xf32>,
    } else {
    }
    return
  }
  func.func @transform_0(%arg0: i32, %arg1: i32, %arg2: i32) -> (i32, i32) {
    %c0_i32 = arith.constant 0 : i32
    %c0_i32_0 = arith.constant 0 : i32
    return %c0_i32, %arg2 : i32, i32
  }
  func.func @transform_1(%arg0: i32, %arg1: i32, %arg2: i32) -> (i32, i32) {
    %c0_i32 = arith.constant 0 : i32
    %c0_i32_0 = arith.constant 0 : i32
    return %arg0, %c0_i32 : i32, i32
  }
  func.func @transform_2(%arg0: i32, %arg1: i32, %arg2: i32) -> (i32, i32) {
    %c0_i32 = arith.constant 0 : i32
    %c0_i32_0 = arith.constant 0 : i32
    return %arg0, %c0_i32 : i32, i32
  }
  func.func @transform_3(%arg0: i32, %arg1: i32, %arg2: i32) -> (i32, i32) {
    %0 = arith.muli %arg2, %arg1 : i32
    %c0_i32 = arith.constant 0 : i32
    return %arg0, %0 : i32, i32
  }
}

</mosaic_0001>

<bundles_post_ra>
// kernel: conv_bn_relu.1
= control target key start
LH: loop header
LB: loop body
LE: loop exit
PB: predicated region body
PF: predicated region fallthrough
CT: control target
= control target key end

     0   :  { %s739_s12 = smov 0   ;;  %s741_s13 = smov 0   ;;  %s848_s0 = inlined_call_operand.vmem [shape: bf16[40,512], index: 0, kind: input, shape index: {}]   ;;  %s849_s1 = inlined_call_operand.vmem [shape: bf16[8,40], index: 1, kind: input, shape index: {}]   ;;  %s850_s2 = inlined_call_operand.vmem [shape: f32[8,2], index: 2, kind: input, shape index: {}]   ;;  %s851_s3 = inlined_call_operand.vmem [shape: f32[8,512], index: 3, kind: output, shape index: {}]  }
   0x1   :  { %s743_s14 = smov 0  }
   0x2 LB: > { %s28_s15 = sadd.s32 1, %s708_s13  ;;  %p619_p0 = scmp.ge.s32.totalorder %s712_s14, 1  ;;  %s712_s14 = sphi %s743_s14, %s13_s14   ;;  %s708_s13 = sphi %s741_s13, %s853_s13   ;;  %s704_s12 = sphi %s739_s12, %s852_s12  }
   0x3   : > { %p30_p1 = scmp.ge.s32.totalorder %s28_s15, 2  ;;  %p179_p2 = scmp.lt.s32.totalorder %s712_s14, 3 }
   0x5   : > { %s855_s15 = smov (%p30_p1, %s28_s15), 0  ;;  %p180_p3 = pnand %p619_p0, %p179_p2 }
   0x6   : > { %p636_p4 = scmp.ne.s32.totalorder (!%p180_p3), %s704_s12, 0 }
   0x7   : > { %183 = sbr.rel (%p180_p3) target bundleno = 786 (0x312), region = 32 }
   0xc   : > { %v252_v0 = vld [vmem:[%s848_s0 + $0x40] sm:$0xff]  ;;  %vm308_vm0 = vcmask 1043456   ;;  %v253_v1 = vld [vmem:[%s848_s0 + $0x48] sm:$0xff]  ;;  %v714_v7 = vmov 0   ;;  %vm304_vm1 = vcmask 326656   ;;  %s716_s17 = smov (!%p636_p4), 1  }
   0xd   : > { %v629_v2 = vcombine.high %v252_v0, %v252_v0  ;;  %v631_v3 = vcombine.high %v253_v1, %v253_v1  ;;  %v628_v4 = vcombine.low %v252_v0, %v252_v0  ;;  %v630_v5 = vcombine.low %v253_v1, %v253_v1  ;;  %v675_v6 = vld [vmem:[%s848_s0 + $0x24] ss:$16 sps:$4 sm:$0xff]   ;;  %353 = vmatprep.mubr.bf16.mxu0 %v714_v7  ;;  %v677_v8 = vld [vmem:[%s848_s0 + $0x2c] ss:$16 sps:$4 sm:$0xff]   ;;  %v679_v11 = vld [vmem:[%s848_s0 + $0x20] ss:$16 sps:$4 sm:$0xff]  }
   0xe   : > { %394 = vmatprep.mubr.bf16.mxu1 %v714_v7  ;;  %v680_v12 = vld [vmem:[%s848_s0 + $0x28] ss:$16 sps:$4 sm:$0xff]   ;;  %v681_v13 = vld [vmem:[%s848_s0 + $0x4] ss:$16 sps:$4 sm:$0xff]   ;;  %v683_v14 = vld [vmem:[%s848_s0 + $0xc] ss:$16 sps:$4 sm:$0xff]  }
   0xf   : > { %632 = vmatprep.subr.msk.bf16.mxu0 %vm308_vm0, %v629_v2  ;;  %634 = vmatprep.subr.msk.bf16.mxu1 %vm308_vm0, %v631_v3  ;;  %v310_v9 = vsel %vm308_vm0, %v628_v4, 0  ;;  %v316_v10 = vsel %vm308_vm0, %v630_v5, 0  ;;  %v685_v15 = vld [vmem:[%s848_s0] ss:$16 sps:$4 sm:$0xff]   ;;  %v686_v16 = vld [vmem:[%s848_s0 + $0x8] ss:$16 sps:$4 sm:$0xff]  }
  0x10   : > { %332 = vmatpush1.bf16.msra.mxu0 %v310_v9  ;;  %373 = vmatpush1.bf16.msra.mxu1 %v316_v10  ;;  %v243_v17 = vld [vmem:[%s849_s1] sm:$0xf]  ;;  %s717_s18 = smov (!%p636_p4), 127  }
  0x11   : > { %333 = vmatprep.subr.bf16.mxu0 %v675_v6  ;;  %374 = vmatprep.subr.bf16.mxu1 %v677_v8 }
  0x14   : > { %334 = vmatpush1.bf16.msra.mxu0 %v679_v11  ;;  %375 = vmatpush1.bf16.msra.mxu1 %v680_v12 }
  0x15   : > { %335 = vmatprep.subr.bf16.mxu0 %v681_v13  ;;  %376 = vmatprep.subr.bf16.mxu1 %v683_v14 }
  0x18   : > { %336 = vmatpush1.bf16.msra.mxu0 %v685_v15  ;;  %377 = vmatpush1.bf16.msra.mxu1 %v686_v16 }
  0x1b   : > { %633 = vmatmul.mubr.msk.bf16.vlgmr.msra.gmra.mxu0 %vm304_vm1, %v243_v17  ;;  %635 = vmatmul.mubr.msk.bf16.vlgmr.msra.gmra.mxu1 %vm304_vm1, %v243_v17 }
  0xdb   : > { %v792_v18 = vpop.f32.mrf.mxu0  ;;  %v794_v19 = vpop.f32.mrf.mxu1 }
  0xdd   : > { %v796_v20 = vpop.f32.mrf.mxu0  ;;  %v798_v21 = vpop.f32.mrf.mxu1  ;;  %406 = sbr.rel (%p636_p4) target bundleno = 643 (0x283), region = 36 }
  0xdf   : > { %v359_v22 = vpop.f32.mrf.mxu0  ;;  %v400_v23 = vpop.f32.mrf.mxu1 }
  0xe1   : > { %v360_v24 = vpop.f32.mrf.mxu0  ;;  %v401_v25 = vpop.f32.mrf.mxu1 }
  0xe2   : > { %v415_v26 = vadd.f32 %v796_v20, %v792_v18  ;;  %v424_v27 = vmul.f32 %v792_v18, %v792_v18  ;;  %v425_v28 = vmul.f32 %v796_v20, %v796_v20  ;;  %v426_v29 = vmul.f32 %v794_v19, %v794_v19  ;;  %v438_v51 = vld [vmem:[%s850_s2] sm:$0xff] }
  0xe3   : > { %v427_v31 = vmul.f32 %v798_v21, %v798_v21  ;;  %vm411_vm2 = vcmask 7168   ;;  %v715_v36 = vmov 0.0  }
  0xe4   : > { %v416_v30 = vadd.f32 %v415_v26, %v794_v19  ;;  %v428_v32 = vadd.f32 %v425_v28, %v424_v27  ;;  %412 = vst.msk [vmem:[#allocation2] sm:$0xff] %vm411_vm2, %v715_v36  ;;  %413 = vst.msk [vmem:[#allocation3] sm:$0xff] %vm411_vm2, %v715_v36 }
  0xe6   : > { %v417_v33 = vadd.f32 %v416_v30, %v798_v21  ;;  %v429_v34 = vadd.f32 %v428_v32, %v426_v29 }
  0xe8   : > { %418 = vadd.xlane.f32.xlu0 %v417_v33  ;;  %v430_v35 = vadd.f32 %v429_v34, %v427_v31 }
  0xeb   : > { %v414_v37 = vld [vmem:[#allocation2] sm:$0xff]  ;;  %v423_v40 = vld [vmem:[#allocation3] sm:$0xff] }
  0xec   : > { %431 = vadd.xlane.f32.xlu0 %v430_v35 }
 0x171   : > { %v419_v38 = vpop.xlane.xlu0 %418 }
 0x172   : > { %v420_v39 = vadd.f32 %v419_v38, %v414_v37 }
 0x174   : > { %422 = vst.msk [vmem:[#allocation2] sm:$0xff] %vm411_vm2, %v420_v39 }
 0x175   : > { %v432_v41 = vpop.xlane.xlu0 %431 }
 0x176   : > { %v433_v42 = vadd.f32 %v432_v41, %v423_v40 }
 0x178   : > { %434 = vst.msk [vmem:[#allocation3] sm:$0xff] %vm411_vm2, %v433_v42 }
 0x17b   : > { %v439_v43 = vld [vmem:[#allocation2] sm:$0xff] }
 0x17c   : > { %v440_v44 = vmul.f32 0.001953125, %v439_v43 }
 0x17e   : > { %v443_v47 = vmul.f32 %v440_v44, %v440_v44 }
 0x17f   : > { %v441_v45 = vld [vmem:[#allocation3] sm:$0xff] }
 0x180   : > { %v442_v46 = vmul.f32 0.001953125, %v441_v45 }
 0x182   : > { %v444_v48 = vsub.f32 %v442_v46, %v443_v47 }
 0x184   : > { %v445_v49 = vmax.f32 %v444_v48, 0.0 }
 0x186   : > { %v446_v50 = vadd.f32 1e-05, %v445_v49 }
 0x188   : > { %687 = vrsqrt.f32 %v446_v50 }
 0x195   : > { %v688_v52 = vpop.eup %687 }
 0x196   : > { %v448_v53 = vmul.f32 %v688_v52, %v438_v51 }
 0x198   : > { %v450_v54 = vmul.f32 %v448_v53, %v440_v44  ;;  %449 = vst.msk [vmem:[#allocation4] sm:$0xff] %vm411_vm2, %v448_v53 }
 0x19a   : > { %452 = vrot.lane.b32.xlu1 %v450_v54, %s716_s17 }
 0x20c   : > { %v453_v55 = vpop.permute.xlu1 %452 }
 0x20d   : > { %v455_v56 = vsub.f32 %v438_v51, %v453_v55 }
 0x20f   : > { %457 = vrot.lane.b32.xlu1 %v455_v56, %s717_s18 }
 0x281   : > { %v458_v57 = vpop.permute.xlu1 %457 }
 0x282   : > { %460 = vst.msk [vmem:[#allocation5] sm:$0xff] %vm411_vm2, %v458_v57 }
 0x283 PF: > { %p637_p5 = scmp.ne.s32.totalorder %s704_s12, 1 }
 0x285   : > { %464 = sbr.rel (%p637_p5) target bundleno = 786 (0x312), region = 48 }
 0x28a   : > { %v465_v58 = vld [vmem:[#allocation4] sm:$0xff]  ;;  %v718_v59 = vmov 0   ;;  %v475_v60 = vld [vmem:[#allocation5] sm:$0xff] }
 0x28b   : > { %689 = vset.pattern.permute.xlu0 %v718_v59 }
 0x28c   : > { %468 = vperm.xlu0 %689, %v465_v58  }
 0x290   : > { %478 = vperm.xlu0 %689, %v475_v60  }
 0x307   : > { %v469_v61 = vpop.permute.xlu0 %468 }
 0x308   : > { %v471_v62 = vmul.f32 %v469_v61, %v792_v18  ;;  %v472_v63 = vmul.f32 %v469_v61, %v796_v20  ;;  %v473_v0 = vmul.f32 %v469_v61, %v794_v19  ;;  %v474_v1 = vmul.f32 %v469_v61, %v798_v21 }
 0x30b   : > { %v479_v2 = vpop.permute.xlu0 %478 }
 0x30c   : > { %v481_v3 = vadd.f32 %v479_v2, %v471_v62  ;;  %v482_v4 = vadd.f32 %v479_v2, %v472_v63  ;;  %v483_v5 = vadd.f32 %v479_v2, %v473_v0  ;;  %v484_v6 = vadd.f32 %v479_v2, %v474_v1 }
 0x30e   : > { %v485_v7 = vmax.f32 %v481_v3, 0.0  ;;  %v486_v8 = vmax.f32 %v482_v4, 0.0  ;;  %v487_v9 = vmax.f32 %v483_v5, 0.0  ;;  %v488_v10 = vmax.f32 %v484_v6, 0.0 }
 0x310   : > { %489 = vst [vmem:[%s851_s3] sm:$0xff] %v485_v7  ;;  %490 = vst [vmem:[%s851_s3 + $0x8] sm:$0xff] %v486_v8 }
 0x311   : > { %491 = vst [vmem:[%s851_s3 + $0x10] sm:$0xff] %v487_v9  ;;  %492 = vst [vmem:[%s851_s3 + $0x18] sm:$0xff] %v488_v10 }
 0x312 PF: > { %s13_s14 = sadd.s32 1, %s712_s14   ;;  %s852_s12 = smov %s708_s13 }
 0x313   : > { %p10_p6 = scmp.ge.s32.totalorder %s13_s14, 4   ;;  %s853_s13 = smov %s855_s15 }
 0x315   :  { %12 = sbr.rel (!%p10_p6) target bundleno = 2 (0x2), region = 84 }

</bundles_post_ra>
